<compile_context>
chip_gen: v5e
topology: v5e:2x2
jax: 0.10.0
libtpu: 0.0.40
codegen_flags: <defaults>
</compile_context>

<pallas_src>
import jax
import jax.numpy as jnp
from jax import lax
from jax.experimental import pallas as pl
from jax.experimental.pallas import tpu as pltpu


def deeponet_kernel(x_ref, u_ref,
                    wt1_ref, bt1_ref, wt2_ref, bt2_ref,
                    wb1_ref, bb1_ref, wb2_ref, bb2_ref,
                    out_ref):
    """One batch tile; batch is mapped to the lane axis of every intermediate.

    x_ref  : [TILE_N, Dx]   trunk inputs (contiguous row block from HBM)
    u_ref  : [TILE_N, Du]   branch inputs
    w*1    : [H, D]         layer-1 weights, stored [out, in]
    b*1    : [H, 1]         layer-1 biases (column)
    w*2    : [P, H]         layer-2 weights, stored [out, in]
    b*2    : [P, 1]         layer-2 biases (column)
    out_ref: [1, TILE_N]    per-row trunk.branch dot product (lane-dense store)
    """
    # Contract dim 1 of both operands: W[out, in] . X[tile, in]^T -> [out, tile].
    # Mosaic handles the implied transpose of the streamed tile internally; no
    # wrapper-side transpose pass is needed.
    dn = (((1,), (1,)), ((), ()))

    # ---- trunk net: tanh(x @ Wt1 + bt1) @ Wt2 + bt2, batch on lanes ----
    zt = lax.dot_general(wt1_ref[...], x_ref[...], dn,
                         preferred_element_type=jnp.float32)
    ht = jnp.tanh(zt + bt1_ref[...])                              # [H, TILE_N]
    yt = jnp.dot(wt2_ref[...], ht,
                 preferred_element_type=jnp.float32) + bt2_ref[...]  # [P, TILE_N]

    # ---- branch net: tanh(u @ Wb1 + bb1) @ Wb2 + bb2 ----
    zb = lax.dot_general(wb1_ref[...], u_ref[...], dn,
                         preferred_element_type=jnp.float32)
    hb = jnp.tanh(zb + bb1_ref[...])                              # [H, TILE_N]
    yb = jnp.dot(wb2_ref[...], hb,
                 preferred_element_type=jnp.float32) + bb2_ref[...]  # [P, TILE_N]

    # ---- torch.einsum('ij,ij->i', trunkout, branchout) ----
    # Sublane reduction over the P features -> lane-dense [1, TILE_N] store.
    out_ref[...] = jnp.sum(yt * yb, axis=0, keepdims=True)


def pack_params(params):
    """One-time transpose of the tiny weights to [out, in] and biases to columns."""
    (wt1, bt1, wt2, bt2, wb1, bb1, wb2, bb2) = params
    return (wt1.T, bt1.T, wt2.T, bt2.T, wb1.T, bb1.T, wb2.T, bb2.T)


def _choose_tile_n(n, max_tile_n):
    """Lane tile: multiple of 128, <= max_tile_n, and (when N allows) >= 4 grid steps
    so the v7x megacore split and the BlockSpec prefetch pipeline stay effective."""
    tile = min(max_tile_n, max(n // 4, 128))
    return max(128, (tile // 128) * 128)


def deeponet_forward(x, u, params, *, tile_n=None, max_tile_n=8192,
                     vmem_limit_bytes=48 << 20):
    """Pallas forward of Model_DeepONet.  x: [N, Dx], u: [N, Du].  Returns [N, 1] f32."""
    n = x.shape[0]
    d_x = x.shape[1]
    d_u = u.shape[1]

    if tile_n is None:
        tile_n = _choose_tile_n(n, max_tile_n)
    if tile_n % 128 != 0:
        raise ValueError("tile_n must be a multiple of 128")

    grid_n = pl.cdiv(n, tile_n)
    n_pad = grid_n * tile_n
    if n_pad != n:
        # Only when the tile does not divide N.  Padded rows never mix with valid rows
        # (all contractions are over feature dims only) and are sliced off at the end.
        x = jnp.pad(x, ((0, n_pad - n), (0, 0)))
        u = jnp.pad(u, ((0, n_pad - n), (0, 0)))

    wt1t, bt1c, wt2t, bt2c, wb1t, bb1c, wb2t, bb2c = pack_params(params)

    def const_spec(shape):
        # Full-array block, constant index -> DMA'd once, VMEM-resident across steps.
        return pl.BlockSpec(shape, lambda i: (0, 0))

    out = pl.pallas_call(
        deeponet_kernel,
        out_shape=jax.ShapeDtypeStruct((1, n_pad), jnp.float32),
        grid=(grid_n,),
        in_specs=[
            # Streamed contiguous row blocks (double-buffered by the BlockSpec pipeline).
            pl.BlockSpec((tile_n, d_x), lambda i: (i, 0)),
            pl.BlockSpec((tile_n, d_u), lambda i: (i, 0)),
            # Tiny weights / biases: VMEM-resident.
            const_spec(wt1t.shape), const_spec(bt1c.shape),
            const_spec(wt2t.shape), const_spec(bt2c.shape),
            const_spec(wb1t.shape), const_spec(bb1c.shape),
            const_spec(wb2t.shape), const_spec(bb2c.shape),
        ],
        out_specs=pl.BlockSpec((1, tile_n), lambda i: (0, i)),
        compiler_params=pltpu.CompilerParams(
            # Batch tiles are independent -> shard across v7x's 2 TensorCores.
            dimension_semantics=("parallel",),
            # ~24 MiB worst-case working set at tile_n=8192 (narrow-lane input tiles pad
            # to 128 lanes in VMEM); 48 MiB is within the review's v7x cap and trivially
            # fine on v5e/v6e's 128 MiB.
            vmem_limit_bytes=vmem_limit_bytes,
        ),
    )(x, u, wt1t, bt1c, wt2t, bt2c, wb1t, bb1c, wb2t, bb2c)

    # Drop batch padding and restore the module's (N, 1) output shape.
    return out[0, :n][:, None]


def init_params(key, d_x, d_u, hidden, p):
    """Deterministic parameter init.  Weights stored [in, out] (PyTorch W.T)."""
    ks = jax.random.split(key, 8)
    scale = 0.1
    wt1 = scale * jax.random.normal(ks[0], (d_x, hidden), jnp.float32)
    bt1 = scale * jax.random.normal(ks[1], (1, hidden), jnp.float32)
    wt2 = scale * jax.random.normal(ks[2], (hidden, p), jnp.float32)
    bt2 = scale * jax.random.normal(ks[3], (1, p), jnp.float32)
    wb1 = scale * jax.random.normal(ks[4], (d_u, hidden), jnp.float32)
    bb1 = scale * jax.random.normal(ks[5], (1, hidden), jnp.float32)
    wb2 = scale * jax.random.normal(ks[6], (hidden, p), jnp.float32)
    bb2 = scale * jax.random.normal(ks[7], (1, p), jnp.float32)
    return (wt1, bt1, wt2, bt2, wb1, bb1, wb2, bb2)


def deeponet_reference(x, u, params):
    """Plain-JAX reference of Model_DeepONet.forward (2-layer tanh trunk/branch MLPs)."""
    (wt1, bt1, wt2, bt2, wb1, bb1, wb2, bb2) = params
    t = jnp.tanh(x @ wt1 + bt1) @ wt2 + bt2
    b = jnp.tanh(u @ wb1 + bb1) @ wb2 + bb2
    out = jnp.einsum('ij,ij->i', t, b)
    return out[:, None]


if __name__ == "__main__":
    # DeepONet-style shapes:
    #   x : [N, d_x]  trunk input (evaluation coordinates)
    #   u : [N, d_u]  branch input (sensor values of the input function)
    # N deliberately not a multiple of 128 to exercise the batch-padding path.
    N, D_X, D_U, HIDDEN, P = 1000, 2, 16, 32, 32

    key = jax.random.PRNGKey(0)
    kx, ku, kp = jax.random.split(key, 3)

    x = jax.random.normal(kx, (N, D_X), jnp.float32)
    u = jax.random.normal(ku, (N, D_U), jnp.float32)
    params = init_params(kp, D_X, D_U, HIDDEN, P)

    ref = deeponet_reference(x, u, params)

    # Tolerance note: both the XLA reference and the Mosaic kernel may round f32 matmul
    # operands to bf16 on the MXU (f32 accumulation) under the TPU default matmul
    # precision, and their pass structures can differ, giving O(1e-3) output deltas.
    # A structural bug (wrong layout / weights / reduction) would be 10-100x larger.
    TOL = dict(atol=1e-2, rtol=1e-2)

    # Auto-chosen lane tile (multiple of 128, >= 4 grid steps for this N).
    out = jax.block_until_ready(deeponet_forward(x, u, params))
    assert out.shape == (N, 1), out.shape
    assert jnp.allclose(out, ref, **TOL), float(jnp.max(jnp.abs(out - ref)))

    # Explicit tile exercising the padding path (1000 -> 1024 rows, 4 grid steps).
    out2 = jax.block_until_ready(deeponet_forward(x, u, params, tile_n=256))
    assert out2.shape == (N, 1), out2.shape
    assert jnp.allclose(out2, ref, **TOL), float(jnp.max(jnp.abs(out2 - ref)))

    print("KERNEL_OK")
</pallas_src>

<mosaic_0001>
module attributes {stable_mosaic.version = 11 : i64} {
  func.func @deeponet_kernel(%arg0: i32, %arg1: memref<128x2xf32, #tpu.memory_space<vmem>>, %arg2: memref<128x16xf32, #tpu.memory_space<vmem>>, %arg3: memref<32x2xf32, #tpu.memory_space<vmem>>, %arg4: memref<32x1xf32, #tpu.memory_space<vmem>>, %arg5: memref<32x32xf32, #tpu.memory_space<vmem>>, %arg6: memref<32x1xf32, #tpu.memory_space<vmem>>, %arg7: memref<32x16xf32, #tpu.memory_space<vmem>>, %arg8: memref<32x1xf32, #tpu.memory_space<vmem>>, %arg9: memref<32x32xf32, #tpu.memory_space<vmem>>, %arg10: memref<32x1xf32, #tpu.memory_space<vmem>>, %arg11: memref<1x128xf32, #tpu.memory_space<vmem>>) attributes {dimension_semantics = [#tpu.dimension_semantics<parallel>], iteration_bounds = array<i64: 8>, scalar_prefetch = 0 : i64, scratch_operands = 0 : i64, tpu.core_type = #tpu.core_type<tc>, window_params = [{transform_indices = @transform_0, window_bounds = array<i64: 128, 2>}, {transform_indices = @transform_1, window_bounds = array<i64: 128, 16>}, {pipeline_mode = #tpu.pipeline_mode<synchronous>, transform_indices = @transform_2, window_bounds = array<i64: 32, 2>}, {pipeline_mode = #tpu.pipeline_mode<synchronous>, transform_indices = @transform_3, window_bounds = array<i64: 32, 1>}, {pipeline_mode = #tpu.pipeline_mode<synchronous>, transform_indices = @transform_4, window_bounds = array<i64: 32, 32>}, {pipeline_mode = #tpu.pipeline_mode<synchronous>, transform_indices = @transform_5, window_bounds = array<i64: 32, 1>}, {pipeline_mode = #tpu.pipeline_mode<synchronous>, transform_indices = @transform_6, window_bounds = array<i64: 32, 16>}, {pipeline_mode = #tpu.pipeline_mode<synchronous>, transform_indices = @transform_7, window_bounds = array<i64: 32, 1>}, {pipeline_mode = #tpu.pipeline_mode<synchronous>, transform_indices = @transform_8, window_bounds = array<i64: 32, 32>}, {pipeline_mode = #tpu.pipeline_mode<synchronous>, transform_indices = @transform_9, window_bounds = array<i64: 32, 1>}, {transform_indices = @transform_10, window_bounds = array<i64: 1, 128>}]} {
    %c0 = arith.constant 0 : index
    %c0_0 = arith.constant 0 : index
    %0 = vector.load %arg3[%c0, %c0_0] : memref<32x2xf32, #tpu.memory_space<vmem>>, vector<32x2xf32>
    %c0_1 = arith.constant 0 : index
    %c0_2 = arith.constant 0 : index
    %1 = vector.load %arg1[%c0_1, %c0_2] : memref<128x2xf32, #tpu.memory_space<vmem>>, vector<128x2xf32>
    %cst = arith.constant dense<0.000000e+00> : vector<32x128xf32>
    %2 = tpu.matmul %0, %1, %cst {dimension_numbers = #tpu.dot_dimension_numbers<[1], [1], [0], [0], [0, 0, 1, 0], [], []>} : vector<32x2xf32>, vector<128x2xf32>, vector<32x128xf32> -> vector<32x128xf32>
    %c0_3 = arith.constant 0 : index
    %c0_4 = arith.constant 0 : index
    %3 = vector.load %arg4[%c0_3, %c0_4] : memref<32x1xf32, #tpu.memory_space<vmem>>, vector<32x1xf32>
    %4 = vector.broadcast %3 : vector<32x1xf32> to vector<32x128xf32>
    %5 = arith.addf %2, %4 : vector<32x128xf32>
    %6 = math.tanh %5 : vector<32x128xf32>
    %c0_5 = arith.constant 0 : index
    %c0_6 = arith.constant 0 : index
    %7 = vector.load %arg5[%c0_5, %c0_6] : memref<32x32xf32, #tpu.memory_space<vmem>>, vector<32x32xf32>
    %cst_7 = arith.constant dense<0.000000e+00> : vector<32x128xf32>
    %8 = tpu.matmul %7, %6, %cst_7 {dimension_numbers = #tpu.dot_dimension_numbers<[1], [0], [0], [1], [0, 0, 1, 1], [], []>} : vector<32x32xf32>, vector<32x128xf32>, vector<32x128xf32> -> vector<32x128xf32>
    %c0_8 = arith.constant 0 : index
    %c0_9 = arith.constant 0 : index
    %9 = vector.load %arg6[%c0_8, %c0_9] : memref<32x1xf32, #tpu.memory_space<vmem>>, vector<32x1xf32>
    %10 = vector.broadcast %9 : vector<32x1xf32> to vector<32x128xf32>
    %11 = arith.addf %8, %10 : vector<32x128xf32>
    %c0_10 = arith.constant 0 : index
    %c0_11 = arith.constant 0 : index
    %12 = vector.load %arg7[%c0_10, %c0_11] : memref<32x16xf32, #tpu.memory_space<vmem>>, vector<32x16xf32>
    %c0_12 = arith.constant 0 : index
    %c0_13 = arith.constant 0 : index
    %13 = vector.load %arg2[%c0_12, %c0_13] : memref<128x16xf32, #tpu.memory_space<vmem>>, vector<128x16xf32>
    %cst_14 = arith.constant dense<0.000000e+00> : vector<32x128xf32>
    %14 = tpu.matmul %12, %13, %cst_14 {dimension_numbers = #tpu.dot_dimension_numbers<[1], [1], [0], [0], [0, 0, 1, 0], [], []>} : vector<32x16xf32>, vector<128x16xf32>, vector<32x128xf32> -> vector<32x128xf32>
    %c0_15 = arith.constant 0 : index
    %c0_16 = arith.constant 0 : index
    %15 = vector.load %arg8[%c0_15, %c0_16] : memref<32x1xf32, #tpu.memory_space<vmem>>, vector<32x1xf32>
    %16 = vector.broadcast %15 : vector<32x1xf32> to vector<32x128xf32>
    %17 = arith.addf %14, %16 : vector<32x128xf32>
    %18 = math.tanh %17 : vector<32x128xf32>
    %c0_17 = arith.constant 0 : index
    %c0_18 = arith.constant 0 : index
    %19 = vector.load %arg9[%c0_17, %c0_18] : memref<32x32xf32, #tpu.memory_space<vmem>>, vector<32x32xf32>
    %cst_19 = arith.constant dense<0.000000e+00> : vector<32x128xf32>
    %20 = tpu.matmul %19, %18, %cst_19 {dimension_numbers = #tpu.dot_dimension_numbers<[1], [0], [0], [1], [0, 0, 1, 1], [], []>} : vector<32x32xf32>, vector<32x128xf32>, vector<32x128xf32> -> vector<32x128xf32>
    %c0_20 = arith.constant 0 : index
    %c0_21 = arith.constant 0 : index
    %21 = vector.load %arg10[%c0_20, %c0_21] : memref<32x1xf32, #tpu.memory_space<vmem>>, vector<32x1xf32>
    %22 = vector.broadcast %21 : vector<32x1xf32> to vector<32x128xf32>
    %23 = arith.addf %20, %22 : vector<32x128xf32>
    %24 = arith.mulf %11, %23 : vector<32x128xf32>
    %cst_22 = arith.constant dense<0.000000e+00> : vector<128xf32>
    %25 = vector.multi_reduction <add>, %24, %cst_22 [0] : vector<32x128xf32> to vector<128xf32>
    %26 = vector.shape_cast %25 : vector<128xf32> to vector<1x128xf32>
    %c0_23 = arith.constant 0 : index
    %c0_24 = arith.constant 0 : index
    %27 = vector.load %arg11[%c0_23, %c0_24] : memref<1x128xf32, #tpu.memory_space<vmem>>, vector<1x128xf32>
    tpu.vector_store %arg11[%c0_23, %c0_24], %26 {strides = array<i32>} : memref<1x128xf32, #tpu.memory_space<vmem>>, vector<1x128xf32>,
    return
  }
  func.func @transform_0(%arg0: i32) -> (i32, i32) {
    %c0_i32 = arith.constant 0 : i32
    %c0_i32_0 = arith.constant 0 : i32
    return %arg0, %c0_i32 : i32, i32
  }
  func.func @transform_1(%arg0: i32) -> (i32, i32) {
    %c0_i32 = arith.constant 0 : i32
    %c0_i32_0 = arith.constant 0 : i32
    return %arg0, %c0_i32 : i32, i32
  }
  func.func @transform_2(%arg0: i32) -> (i32, i32) {
    %c0_i32 = arith.constant 0 : i32
    %c0_i32_0 = arith.constant 0 : i32
    %c0_i32_1 = arith.constant 0 : i32
    return %c0_i32, %c0_i32_0 : i32, i32
  }
  func.func @transform_3(%arg0: i32) -> (i32, i32) {
    %c0_i32 = arith.constant 0 : i32
    %c0_i32_0 = arith.constant 0 : i32
    %c0_i32_1 = arith.constant 0 : i32
    return %c0_i32, %c0_i32_0 : i32, i32
  }
  func.func @transform_4(%arg0: i32) -> (i32, i32) {
    %c0_i32 = arith.constant 0 : i32
    %c0_i32_0 = arith.constant 0 : i32
    %c0_i32_1 = arith.constant 0 : i32
    return %c0_i32, %c0_i32_0 : i32, i32
  }
  func.func @transform_5(%arg0: i32) -> (i32, i32) {
    %c0_i32 = arith.constant 0 : i32
    %c0_i32_0 = arith.constant 0 : i32
    %c0_i32_1 = arith.constant 0 : i32
    return %c0_i32, %c0_i32_0 : i32, i32
  }
  func.func @transform_6(%arg0: i32) -> (i32, i32) {
    %c0_i32 = arith.constant 0 : i32
    %c0_i32_0 = arith.constant 0 : i32
    %c0_i32_1 = arith.constant 0 : i32
    return %c0_i32, %c0_i32_0 : i32, i32
  }
  func.func @transform_7(%arg0: i32) -> (i32, i32) {
    %c0_i32 = arith.constant 0 : i32
    %c0_i32_0 = arith.constant 0 : i32
    %c0_i32_1 = arith.constant 0 : i32
    return %c0_i32, %c0_i32_0 : i32, i32
  }
  func.func @transform_8(%arg0: i32) -> (i32, i32) {
    %c0_i32 = arith.constant 0 : i32
    %c0_i32_0 = arith.constant 0 : i32
    %c0_i32_1 = arith.constant 0 : i32
    return %c0_i32, %c0_i32_0 : i32, i32
  }
  func.func @transform_9(%arg0: i32) -> (i32, i32) {
    %c0_i32 = arith.constant 0 : i32
    %c0_i32_0 = arith.constant 0 : i32
    %c0_i32_1 = arith.constant 0 : i32
    return %c0_i32, %c0_i32_0 : i32, i32
  }
  func.func @transform_10(%arg0: i32) -> (i32, i32) {
    %c0_i32 = arith.constant 0 : i32
    %c0_i32_0 = arith.constant 0 : i32
    return %c0_i32, %arg0 : i32, i32
  }
}

</mosaic_0001>

<bundles_post_ra>
// kernel: tpu_custom_call.1
= control target key start
LH: loop header
LB: loop body
LE: loop exit
PB: predicated region body
PF: predicated region fallthrough
CT: control target
= control target key end

     0   :  { %s1394_s0 = inlined_call_operand.vmem [shape: f32[1024,2], index: 0, kind: input, shape index: {}]   ;;  %s1395_s1 = inlined_call_operand.vmem [shape: f32[1024,16], index: 1, kind: input, shape index: {}]   ;;  %s1396_s2 = inlined_call_operand.vmem [shape: f32[32,2], index: 2, kind: input, shape index: {}]   ;;  %s1397_s3 = inlined_call_operand.vmem [shape: f32[32,1], index: 3, kind: input, shape index: {}]   ;;  %s1398_s4 = inlined_call_operand.vmem [shape: f32[32,32], index: 4, kind: input, shape index: {}]   ;;  %s1399_s5 = inlined_call_operand.vmem [shape: f32[32,1], index: 5, kind: input, shape index: {}]   ;;  %s1400_s6 = inlined_call_operand.vmem [shape: f32[32,16], index: 6, kind: input, shape index: {}]   ;;  %s1401_s7 = inlined_call_operand.vmem [shape: f32[32,1], index: 7, kind: input, shape index: {}]   ;;  %s1402_s8 = inlined_call_operand.vmem [shape: f32[32,32], index: 8, kind: input, shape index: {}]   ;;  %s1403_s9 = inlined_call_operand.vmem [shape: f32[32,1], index: 9, kind: input, shape index: {}]   ;;  %s1404_s10 = inlined_call_operand.hbm [shape: f32[1,1024], index: 10, kind: output, shape index: {}]  }
   0x1   :  { %1405 = sst [smem:[#allocation5_spill]] %s1394_s0 }
   0x2   :  { %15 = vsyncpa [#allocation3], 0 }
   0x3   :  { %17 = vsyncpa [#allocation3 + $0x1], 0  ;;  %s1127_s13 = smov 0   ;;  %s1129_s14 = smov 0  }
   0x4   :  { %s1131_s15 = smov 0   ;;  %s1133_s16 = smov 0  }
   0x5 LB: > { %s1148_s17 = sadd.s32 4294967295, %s1069_s16   ;;  %s890_s18 = sadd.s32 4294967294, %s1069_s16   ;;  %s1069_s16 = sphi %s1133_s16, %s1412_s16   ;;  %s1065_s15 = sphi %s1131_s15, %s1411_s15   ;;  %s1061_s14 = sphi %s1129_s14, %s1410_s14   ;;  %s1057_s13 = sphi %s1127_s13, %s1409_s13  }
   0x6   : > { %s1152_s19 = sadd.s32 1, %s1069_s16   ;;  %s250_s20 = sadd.s32 1, %s1065_s15 }
   0x7   : > { %s247_s21 = ssub.s32 %s1069_s16, %s1152_s19  ;;  %p260_p0 = scmp.ne.s32.totalorder %s1065_s15, %s1061_s14 }
   0x8   : > { %p248_p1 = scmp.eq.s32.totalorder %s247_s21, 0  ;;  %p261_p2 = scmp.eq.s32.totalorder %s1148_s17, 7 }
   0x9   : > { %p266_p3 = scmp.ne.s32.totalorder %s1061_s14, %s1057_s13  ;;  %p267_p4 = scmp.eq.s32.totalorder %s890_s18, 7 }
   0xa   : > { %s1163_s22 = scalar_select %p248_p1, %s1065_s15, %s250_s20  }
   0xb   : > { %p1165_p5 = por %p261_p2, %p260_p0  ;;  %p1169_p6 = por %p267_p4, %p266_p3 }
   0xc   : > { %p893_p7 = scmp.ge.s32.totalorder %s1069_s16, 1  ;;  %p327_p8 = scmp.lt.s32.totalorder %s1069_s16, 9 }
   0xe   : > { %p328_p9 = pnand %p893_p7, %p327_p8 }
   0xf   : > { %s894_s25 = sshll.u32 (!%p328_p9), %s1148_s17, 4  ;;  %s1408_s0 = sld [smem:[#allocation5_spill]] (!%p328_p9) }
  0x10   : > { %331 = sbr.rel (%p328_p9) target bundleno = 438 (0x1b6), region = 60  ;;  %p370_p10 = scmp.lt.s32.totalorder (!%p328_p9), %s894_s25, 127 }
  0x11   : > { %s367_s21 = sand.u32 (!%p328_p9), 1, %s1061_s14   ;;  %s819_s27 = scalar_lea.hbm (!%p328_p9), %s1404_s10, %s1148_s17 }
  0x12   : > { %s368_s28 = scalar_lea.vmem (!%p328_p9), [#allocation2], %s367_s21  ;;  %s1027_s17 = scalar_lea.hbm (!%p328_p9), %s1404_s10, 8 }
  0x13   : > { %s821_s30 = sshll.u32 (!%p328_p9), %s368_s28, 4  ;;  %s822_s30 = int_to_ptr.vmem [resolvable:$true] %s821_s30 }
  0x15   : > { %s1414_s25 = smov (!%p370_p10, %s894_s25), 127  ;;  %vm425_vm0 = vcmask 15360   ;;  %vm633_vm1 = vcmask 130048   ;;  %v612_v14 = vld [vmem:[%s1401_s7 + $0x18] sm:$0xff]  ;;  %v1071_v17 = vmov 0   ;;  %v611_v20 = vld [vmem:[%s1401_s7 + $0x10] sm:$0xff] }
  0x16   : > { %s895_s26 = sshll.u32 %s1414_s25, 3  ;;  %988 = vset.pattern.permute.xlu0 %v1071_v17  ;;  %989 = vset.pattern.permute.xlu1 %v1071_v17  ;;  %v610_v21 = vld [vmem:[%s1401_s7 + $0x8] sm:$0xff]  ;;  %v404_v27 = vld [vmem:[%s1397_s3 + $0x18] sm:$0xff]  ;;  %v401_v33 = vld [vmem:[%s1397_s3] sm:$0xff]  ;;  %vm547_vm2 = vcmask 261120  }
  0x17   : > { %s1179_s29 = scalar_lea.vmem %s1408_s0, %s895_s26  ;;  %s1184_s12 = scalar_lea.vmem %s1395_s1, %s895_s26  ;;  %630 = vperm.xlu0 %988, %v612_v14   ;;  %990 = vset.pattern.permute.xlu2 %v1071_v17  ;;  %v402_v26 = vld [vmem:[%s1397_s3 + $0x8] sm:$0xff]  ;;  %v525_v38 = vld [vmem:[%s1399_s5 + $0x10] sm:$0xff]  ;;  %v731_v39 = vld [vmem:[%s1403_s9] sm:$0xff] }
  0x18   : > { %v400_v0 = vld [vmem:[%s1179_s29 + $0x78] sm:$0xff]  ;;  %v399_v2 = vld [vmem:[%s1179_s29 + $0x70] sm:$0xff]  ;;  %v398_v4 = vld [vmem:[%s1179_s29 + $0x68] sm:$0xff]  ;;  %620 = vperm.xlu1 %989, %v610_v21  }
  0x19   : > { %v608_v1 = vld [vmem:[%s1184_s12 + $0x78] sm:$0xff]  ;;  %898 = vmatpush.xpose.msk.msra.mxu0 %vm425_vm0, %v400_v0  ;;  %v607_v3 = vld [vmem:[%s1184_s12 + $0x70] sm:$0xff]  ;;  %v606_v5 = vld [vmem:[%s1184_s12 + $0x68] sm:$0xff] }
  0x1a   : > { %922 = vmatpush.xpose.msk.msra.mxu2 %vm633_vm1, %v608_v1  ;;  %v397_v6 = vld [vmem:[%s1179_s29 + $0x60] sm:$0xff]  ;;  %v396_v8 = vld [vmem:[%s1179_s29 + $0x58] sm:$0xff]  ;;  %v395_v10 = vld [vmem:[%s1179_s29 + $0x50] sm:$0xff] }
  0x1b   : > { %v605_v7 = vld [vmem:[%s1184_s12 + $0x60] sm:$0xff]  ;;  %v604_v9 = vld [vmem:[%s1184_s12 + $0x58] sm:$0xff]  ;;  %v603_v11 = vld [vmem:[%s1184_s12 + $0x50] sm:$0xff] }
  0x1c   : > { %v394_v12 = vld [vmem:[%s1179_s29 + $0x48] sm:$0xff]  ;;  %v393_v15 = vld [vmem:[%s1179_s29 + $0x40] sm:$0xff]  ;;  %v392_v18 = vld [vmem:[%s1179_s29 + $0x38] sm:$0xff] }
  0x1d   : > { %899 = vmatpush.xpose.msk.msra.mxu0 %vm425_vm0, %v399_v2  ;;  %v602_v13 = vld [vmem:[%s1184_s12 + $0x48] sm:$0xff]  ;;  %v601_v16 = vld [vmem:[%s1184_s12 + $0x40] sm:$0xff]  ;;  %v600_v19 = vld [vmem:[%s1184_s12 + $0x38] sm:$0xff] }
  0x1e   : > { %923 = vmatpush.xpose.msk.msra.mxu2 %vm633_vm1, %v607_v3  ;;  %v391_v22 = vld [vmem:[%s1179_s29 + $0x30] sm:$0xff]  ;;  %v390_v24 = vld [vmem:[%s1179_s29 + $0x28] sm:$0xff]  ;;  %v389_v28 = vld [vmem:[%s1179_s29 + $0x20] sm:$0xff] }
  0x1f   : > { %v599_v23 = vld [vmem:[%s1184_s12 + $0x30] sm:$0xff]  ;;  %625 = vperm.xlu0 %988, %v611_v20   ;;  %v598_v25 = vld [vmem:[%s1184_s12 + $0x28] sm:$0xff]  ;;  %v597_v29 = vld [vmem:[%s1184_s12 + $0x20] sm:$0xff] }
  0x20   : > { %422 = vperm.xlu1 %989, %v404_v27   ;;  %v388_v30 = vld [vmem:[%s1179_s29 + $0x18] sm:$0xff]  ;;  %v524_v32 = vld [vmem:[%s1399_s5 + $0x8] sm:$0xff]  ;;  %v387_v34 = vld [vmem:[%s1179_s29 + $0x10] sm:$0xff] }
  0x21   : > { %900 = vmatpush.xpose.msk.msra.mxu0 %vm425_vm0, %v398_v4  ;;  %v596_v31 = vld [vmem:[%s1184_s12 + $0x18] sm:$0xff]  ;;  %v595_v35 = vld [vmem:[%s1184_s12 + $0x10] sm:$0xff]  ;;  %v386_v36 = vld [vmem:[%s1179_s29 + $0x8] sm:$0xff] }
  0x22   : > { %924 = vmatpush.xpose.msk.msra.mxu2 %vm633_vm1, %v606_v5  ;;  %v594_v37 = vld [vmem:[%s1184_s12 + $0x8] sm:$0xff]  ;;  %v609_v40 = vld [vmem:[%s1401_s7] sm:$0xff]  ;;  %v733_v45 = vld [vmem:[%s1403_s9 + $0x10] sm:$0xff] }
  0x23   : > { %v385_v41 = vld [vmem:[%s1179_s29] sm:$0xff]  ;;  %615 = vperm.xlu2 %990, %v609_v40   ;;  %v403_v46 = vld [vmem:[%s1397_s3 + $0x10] sm:$0xff]  ;;  %v734_v47 = vld [vmem:[%s1403_s9 + $0x18] sm:$0xff]  ;;  %s823_s29 = sshll.u32 %s819_s27, 4  ;;  %s824_s29 = int_to_ptr.hbm [resolvable:$true] %s823_s29 }
  0x24   : > { %v593_v42 = vld [vmem:[%s1184_s12] sm:$0xff]  ;;  %v382_v48 = vld [vmem:[%s1396_s2 + $0x8] sm:$0xff]  ;;  %v383_v51 = vld [vmem:[%s1396_s2 + $0x10] sm:$0xff]  ;;  %s811_s12 = scalar_lea.sflag [#allocation3], %s367_s21  ;;  %s1021_s11 = sshra.s32 %s824_s29, 4  ;;  %s1022_s11 = int_to_ptr.hbm [resolvable:$true] %s1021_s11 }
  0x25   : > { %901 = vmatpush.xpose.msk.msra.mxu0 %vm425_vm0, %v397_v6  ;;  %v381_v43 = vld [vmem:[%s1396_s2] sm:$0xff]  ;;  %v590_v49 = vld [vmem:[%s1400_s6 + $0x8] sm:$0xff]  ;;  %v591_v52 = vld [vmem:[%s1400_s6 + $0x10] sm:$0xff]  ;;  %s1023_s18 = scalar_lea.hbm %s1022_s11, 1  ;;  %p1028_p0 = scmp.lt.s32.totalorder %s1022_s11, %s1404_s10 }
  0x26   : > { %925 = vmatpush.xpose.msk.msra.mxu2 %vm633_vm1, %v605_v7  ;;  %v589_v44 = vld [vmem:[%s1400_s6] sm:$0xff]  ;;  %v732_v53 = vld [vmem:[%s1403_s9 + $0x8] sm:$0xff]  ;;  %v384_v54 = vld [vmem:[%s1396_s2 + $0x18] sm:$0xff]  ;;  %p1024_p11 = scmp.ne.s32.totalorder %s1022_s11, %s1023_s18  ;;  %p1029_p1 = scmp.lt.s32.totalorder %s1027_s17, %s1023_s18 }
  0x27   : > { %412 = vperm.xlu0 %988, %v402_v26   ;;  %v523_v50 = vld [vmem:[%s1399_s5] sm:$0xff]  ;;  %v592_v55 = vld [vmem:[%s1400_s6 + $0x18] sm:$0xff]  ;;  %v520_v27 = vld [vmem:[%s1398_s4 + $0x8] sm:$0xff] }
  0x28   : > { %407 = vperm.xlu1 %989, %v401_v33   ;;  %v526_v56 = vld [vmem:[%s1399_s5 + $0x18] sm:$0xff]  ;;  %v519_v21 = vld [vmem:[%s1398_s4] sm:$0xff]  ;;  %p1025_p12 = pnand %p1024_p11, %p1165_p5  ;;  %p1030_p2 = por %p1029_p1, %p1028_p0 }
  0x29   : > { %902 = vmatpush.xpose.msk.msra.mxu0 %vm425_vm0, %v396_v8 }
  0x2a   : > { %926 = vmatpush.xpose.msk.msra.mxu2 %vm633_vm1, %v604_v9  ;;  %p1026_p13 = pneg %p1025_p12 }
  0x2b   : > { %417 = vperm.xlu2 %990, %v403_v46  }
  0x2c   : > { %p1031_p3 = pnand %p1030_p2, %p1026_p13 }
  0x2d   : > { %903 = vmatpush.xpose.msk.msra.mxu0 %vm425_vm0, %v395_v10 }
  0x2e   : > { %927 = vmatpush.xpose.msk.msra.mxu2 %vm633_vm1, %v603_v11 }
  0x2f   : > { %534 = vperm.xlu0 %988, %v524_v32   ;;  %v730_v32 = vld [vmem:[%s1402_s8 + $0x18] sm:$0xff] }
  0x30   : > { %737 = vperm.xlu1 %989, %v731_v39  }
  0x31   : > { %904 = vmatpush.xpose.msk.msra.mxu0 %vm425_vm0, %v394_v12 }
  0x32   : > { %928 = vmatpush.xpose.msk.msra.mxu2 %vm633_vm1, %v602_v13 }
  0x33   : > { %529 = vperm.xlu2 %990, %v523_v50  }
  0x35   : > { %905 = vmatpush.xpose.msk.msra.mxu0 %vm425_vm0, %v393_v15 }
  0x36   : > { %929 = vmatpush.xpose.msk.msra.mxu2 %vm633_vm1, %v601_v16 }
  0x37   : > { %539 = vperm.xlu0 %988, %v525_v38  }
  0x38   : > { %747 = vperm.xlu1 %989, %v733_v45  }
  0x39   : > { %906 = vmatpush.xpose.msk.msra.mxu0 %vm425_vm0, %v392_v18 }
  0x3a   : > { %930 = vmatpush.xpose.msk.msra.mxu2 %vm633_vm1, %v600_v19 }
  0x3b   : > { %742 = vperm.xlu2 %990, %v732_v53  }
  0x3d   : > { %907 = vmatpush.xpose.msk.msra.mxu0 %vm425_vm0, %v391_v22 }
  0x3e   : > { %931 = vmatpush.xpose.msk.msra.mxu2 %vm633_vm1, %v599_v23 }
  0x3f   : > { %752 = vperm.xlu0 %988, %v734_v47  }
  0x41   : > { %908 = vmatpush.xpose.msk.msra.mxu0 %vm425_vm0, %v390_v24 }
  0x42   : > { %932 = vmatpush.xpose.msk.msra.mxu2 %vm633_vm1, %v598_v25  ;;  %v727_v25 = vld [vmem:[%s1402_s8] sm:$0xff] }
  0x43   : > { %544 = vperm.xlu2 %990, %v526_v56  }
  0x45   : > { %909 = vmatpush.xpose.msk.msra.mxu0 %vm425_vm0, %v389_v28  ;;  %v728_v28 = vld [vmem:[%s1402_s8 + $0x8] sm:$0xff] }
  0x46   : > { %933 = vmatpush.xpose.msk.msra.mxu2 %vm633_vm1, %v597_v29  ;;  %v521_v29 = vld [vmem:[%s1398_s4 + $0x10] sm:$0xff] }
  0x49   : > { %910 = vmatpush.xpose.msk.msra.mxu0 %vm425_vm0, %v388_v30  ;;  %v729_v30 = vld [vmem:[%s1402_s8 + $0x10] sm:$0xff] }
  0x4a   : > { %934 = vmatpush.xpose.msk.msra.mxu2 %vm633_vm1, %v596_v31  ;;  %v522_v31 = vld [vmem:[%s1398_s4 + $0x18] sm:$0xff] }
  0x4d   : > { %911 = vmatpush.xpose.msk.msra.mxu0 %vm425_vm0, %v387_v34 }
  0x4e   : > { %935 = vmatpush.xpose.msk.msra.mxu2 %vm633_vm1, %v595_v35 }
  0x51   : > { %912 = vmatpush.xpose.msk.msra.mxu0 %vm425_vm0, %v386_v36 }
  0x52   : > { %936 = vmatpush.xpose.msk.msra.mxu2 %vm633_vm1, %v594_v37 }
  0x55   : > { %913 = vmatpush.xpose.msk.msra.mxu0 %vm425_vm0, %v385_v41 }
  0x56   : > { %937 = vmatpush.xpose.msk.msra.mxu2 %vm633_vm1, %v593_v42 }
  0x58   : > { %914 = vmatmul.msk.f32.vlgmr.msra.gmra.mxu0 %vm425_vm0, %v381_v43 }
  0x59   : > { %938 = vmatmul.msk.f32.vlgmr.msra.gmra.mxu2 %vm633_vm1, %v589_v44 }
  0x60   : > { %915 = vmatmul.msk.f32.gmra.mxu0 %vm425_vm0, %v382_v48 }
  0x61   : > { %939 = vmatmul.msk.f32.gmra.mxu2 %vm633_vm1, %v590_v49 }
  0x68   : > { %916 = vmatmul.msk.f32.gmra.mxu0 %vm425_vm0, %v383_v51 }
  0x69   : > { %940 = vmatmul.msk.f32.gmra.mxu2 %vm633_vm1, %v591_v52 }
  0x70   : > { %917 = vmatmul.msk.f32.gmra.mxu0 %vm425_vm0, %v384_v54 }
  0x71   : > { %941 = vmatmul.msk.f32.gmra.mxu2 %vm633_vm1, %v592_v55 }
  0x7d   : > { %v616_v62 = vpop.permute.xlu2 %615 }
  0x85   : > { %v418_v3 = vpop.permute.xlu2 %417 }
  0x89   : > { %v631_v58 = vpop.permute.xlu0 %630 }
  0x8a   : > { %v621_v60 = vpop.permute.xlu1 %620 }
  0x8d   : > { %v530_v37 = vpop.permute.xlu2 %529 }
  0x91   : > { %v626_v0 = vpop.permute.xlu0 %625 }
  0x92   : > { %v423_v2 = vpop.permute.xlu1 %422 }
  0x95   : > { %v743_v42 = vpop.permute.xlu2 %742 }
  0x99   : > { %v413_v8 = vpop.permute.xlu0 %412 }
  0x9a   : > { %v408_v10 = vpop.permute.xlu1 %407 }
  0x9d   : > { %v545_v56 = vpop.permute.xlu2 %544 }
  0xa1   : > { %v535_v36 = vpop.permute.xlu0 %534 }
  0xa2   : > { %v738_v38 = vpop.permute.xlu1 %737 }
  0xa9   : > { %v540_v41 = vpop.permute.xlu0 %539 }
  0xaa   : > { %v748_v45 = vpop.permute.xlu1 %747 }
  0xb1   : > { %v753_v53 = vpop.permute.xlu0 %752 }
  0xd5   : > { %v503_v57 = vpop.f32.mrf.mxu0 }
  0xd6   : > { %v504_v11 = vadd.f32 %v503_v57, %v408_v10 }
  0xdc   : > { %v711_v59 = vpop.f32.mrf.mxu2 }
  0xdd   : > { %v506_v61 = vpop.f32.mrf.mxu0  ;;  %v712_v18 = vadd.f32 %v711_v59, %v616_v62 }
  0xde   : > { %v507_v9 = vadd.f32 %v506_v61, %v413_v8 }
  0xe4   : > { %v714_v63 = vpop.f32.mrf.mxu2 }
  0xe5   : > { %v509_v1 = vpop.f32.mrf.mxu0  ;;  %v715_v17 = vadd.f32 %v714_v63, %v621_v60 }
  0xe6   : > { %v510_v4 = vadd.f32 %v509_v1, %v418_v3 }
  0xe8   : > { %991 = vtanh.f32 %v510_v4 }
  0xec   : > { %v717_v5 = vpop.f32.mrf.mxu2 }
  0xed   : > { %v512_v6 = vpop.f32.mrf.mxu0  ;;  %v718_v13 = vadd.f32 %v717_v5, %v626_v0 }
  0xee   : > { %v513_v7 = vadd.f32 %v512_v6, %v423_v2  ;;  %v992_v15 = vpop.eup %991 }
  0xf0   : > { %993 = vtanh.f32 %v513_v7 }
  0xf1   : > { %995 = vtanh.f32 %v507_v9 }
  0xf2   : > { %997 = vtanh.f32 %v504_v11 }
  0xf4   : > { %v720_v12 = vpop.f32.mrf.mxu2 }
  0xf5   : > { %v721_v14 = vadd.f32 %v720_v12, %v631_v58 }
  0xf6   : > { %v994_v16 = vpop.eup %993 }
  0xf7   : > { %999 = vtanh.f32 %v721_v14  ;;  %572 = vmatpush.msra.mxu1 %v994_v16  ;;  %v996_v19 = vpop.eup %995 }
  0xf8   : > { %1001 = vtanh.f32 %v718_v13  ;;  %v998_v20 = vpop.eup %997 }
  0xf9   : > { %573 = vmatpush.msra.mxu1 %v992_v15  ;;  %1003 = vtanh.f32 %v715_v17 }
  0xfa   : > { %1005 = vtanh.f32 %v712_v18 }
  0xfb   : > { %574 = vmatpush.msra.mxu1 %v996_v19 }
  0xfd   : > { %v1000_v22 = vpop.eup %999  ;;  %575 = vmatpush.msra.mxu1 %v998_v20 }
  0xfe   : > { %779 = vmatpush.msra.mxu3 %v1000_v22  ;;  %v1002_v23 = vpop.eup %1001  ;;  %918 = vmatmul.msk.f32.vlgmr.msra.gmra.mxu1 %vm547_vm2, %v519_v21 }
  0xff   : > { %v1004_v24 = vpop.eup %1003 }
 0x100   : > { %780 = vmatpush.msra.mxu3 %v1002_v23  ;;  %v1006_v26 = vpop.eup %1005 }
 0x102   : > { %781 = vmatpush.msra.mxu3 %v1004_v24 }
 0x104   : > { %782 = vmatpush.msra.mxu3 %v1006_v26 }
 0x105   : > { %942 = vmatmul.msk.f32.vlgmr.msra.gmra.mxu3 %vm547_vm2, %v727_v25 }
 0x106   : > { %919 = vmatmul.msk.f32.gmra.mxu1 %vm547_vm2, %v520_v27 }
 0x10d   : > { %943 = vmatmul.msk.f32.gmra.mxu3 %vm547_vm2, %v728_v28 }
 0x10e   : > { %920 = vmatmul.msk.f32.gmra.mxu1 %vm547_vm2, %v521_v29 }
 0x115   : > { %944 = vmatmul.msk.f32.gmra.mxu3 %vm547_vm2, %v729_v30 }
 0x116   : > { %921 = vmatmul.msk.f32.gmra.mxu1 %vm547_vm2, %v522_v31 }
 0x11d   : > { %945 = vmatmul.msk.f32.gmra.mxu3 %vm547_vm2, %v730_v32 }
 0x17b   : > { %v577_v33 = vpop.f32.mrf.mxu1 }
 0x17c   : > { %v578_v49 = vadd.f32 %v577_v33, %v530_v37 }
 0x183   : > { %v580_v35 = vpop.f32.mrf.mxu1 }
 0x184   : > { %v581_v46 = vadd.f32 %v580_v35, %v535_v36 }
 0x188   : > { %v784_v34 = vpop.f32.mrf.mxu3 }
 0x189   : > { %v785_v47 = vadd.f32 %v784_v34, %v738_v38 }
 0x18b   : > { %v583_v40 = vpop.f32.mrf.mxu1  ;;  %v796_v54 = vmul.f32 %v785_v47, %v578_v49 }
 0x18c   : > { %v584_v50 = vadd.f32 %v583_v40, %v540_v41 }
 0x190   : > { %v787_v39 = vpop.f32.mrf.mxu3 }
 0x191   : > { %v788_v44 = vadd.f32 %v787_v39, %v743_v42 }
 0x193   : > { %v797_v51 = vmul.f32 %v788_v44, %v581_v46  ;;  %v586_v52 = vpop.f32.mrf.mxu1 }
 0x194   : > { %v587_v59 = vadd.f32 %v586_v52, %v545_v56 }
 0x195   : > { %v800_v58 = vadd.f32 %v797_v51, %v796_v54 }
 0x198   : > { %v790_v43 = vpop.f32.mrf.mxu3 }
 0x199   : > { %v791_v48 = vadd.f32 %v790_v43, %v748_v45 }
 0x19b   : > { %v798_v55 = vmul.f32 %v791_v48, %v584_v50 }
 0x19d   : > { %v801_v61 = vadd.f32 %v800_v58, %v798_v55 }
 0x1a0   : > { %v793_v57 = vpop.f32.mrf.mxu3 }
 0x1a1   : > { %v794_v60 = vadd.f32 %v793_v57, %v753_v53 }
 0x1a3   : > { %v799_v62 = vmul.f32 %v794_v60, %v587_v59 }
 0x1a5   : > { %v802_v63 = vadd.f32 %v801_v61, %v799_v62 }
 0x1a7   : > { %v803_v0 = vrot.slane %v802_v63, 4 }
 0x1a9   : > { %v804_v1 = vadd.f32 %v803_v0, %v802_v63 }
 0x1ab   : > { %v805_v2 = vrot.slane %v804_v1, 2 }
 0x1ad   : > { %v806_v3 = vadd.f32 %v805_v2, %v804_v1 }
 0x1af   : > { %v807_v4 = vrot.slane %v806_v3, 1 }
 0x1b1   : > { %v808_v5 = vadd.f32 %v807_v4, %v806_v3 }
 0x1b3   : > { %809 = vst [vmem:[%s368_s28] sm:$0x1] %v808_v5 }
 0x1b4   : > { %1034 = shalt.err (!%p1031_p3)
}
 0x1b5   : > { %948 = dma.vmem_to_hbm [thread:$0]  (%p1165_p5), %s822_s30, 16, %s824_s29, %s811_s12  }
 0x1b6 PF: > { %p954_p4 = scmp.ge.s32.totalorder %s1069_s16, 2  ;;  %s835_s21 = sand.u32 1, %s1057_s13  }
 0x1b7   : > { %s836_s27 = scalar_lea.sflag [#allocation3], %s835_s21 }
 0x1b8   : > { %p951_p7 = pnand %p954_p4, %p1169_p6 }
 0x1ba   : > { %p952_p8 = pneg %p951_p7 }
 0x1bc   : > { %1052 = dma.done.wait (%p952_p8), %s836_s27, 16  }
 0x1bd   : > { %1054 = vsyncadd (%p952_p8), %s836_s27, 4294967280  ;;  %p20_p9 = scmp.ge.s32.totalorder %s1152_s19, 10   ;;  %s1409_s13 = smov %s1061_s14 }
 0x1be   : > { %s1410_s14 = smov %s1065_s15  ;;  %s1411_s15 = smov %s1163_s22 }
 0x1bf   : > { %s1412_s16 = smov %s1152_s19  ;;  %22 = sbr.rel (!%p20_p9) target bundleno = 5 (0x5), region = 98 }
 0x1c4   :  { %841 = vsyncpa [#allocation3], 1 }
 0x1c5   :  { %843 = vsyncpa [#allocation3 + $0x1], 1 }

</bundles_post_ra>
